<compile_context>
chip_gen: v6e
topology: v6e:2x2x1
jax: 0.10.0
libtpu: 0.0.40
codegen_flags: <defaults>
</compile_context>

<pallas_src>
import functools
import math

import jax
import jax.numpy as jnp
from jax import lax
from jax.experimental import pallas as pl
from jax.experimental.pallas import tpu as pltpu

KSIZE = 7
PAD = KSIZE // 2


def _sublane_multiple(dtype):
    itemsize = jnp.dtype(dtype).itemsize
    return 8 * max(1, 4 // itemsize)      # f32 -> 8, bf16 -> 16, int8 -> 32


def _padded_bytes(shape, dtype):
    """VMEM footprint of a block, accounting for (sublane,128)/dtype tile padding."""
    itemsize = jnp.dtype(dtype).itemsize
    sub = _sublane_multiple(dtype)
    if len(shape) == 0:
        return itemsize
    if len(shape) == 1:
        lead, rows, cols = 1, 1, shape[0]
    else:
        lead = int(math.prod(shape[:-2])) if len(shape) > 2 else 1
        rows, cols = shape[-2], shape[-1]
    prows = pl.cdiv(rows, sub) * sub
    pcols = pl.cdiv(cols, 128) * 128
    return lead * prows * pcols * itemsize


def _pick_c_tile(C, HW, dtype, block_budget_bytes):
    """Largest channel tile whose folded (c_tile, H*W) slab fits the block budget.
    Prefers c_tile == C (single sweep); otherwise a multiple of the native sublane
    packing so the BlockSpec stays tile-aligned."""
    itemsize = jnp.dtype(dtype).itemsize
    sub = _sublane_multiple(dtype)
    per_ch = (pl.cdiv(HW, 128) * 128) * itemsize
    max_ch = max(1, int(block_budget_bytes) // per_ch)
    if C <= max_ch:
        return C
    return max(sub, (max_ch // sub) * sub)


def _make_band(conv_weight, W, C):
    """Fused banded 'same'-conv weights, shape (KSIZE, 2W, W) f32.
    Rows [0, W) of the contraction axis act on the channel-SUM plane (pre-scaled by
    1/C so sum == mean * C works directly); rows [W, 2W) act on the channel-MAX plane.
    band[dy, wi, wo] = w[plane, dy, wi - wo + PAD] inside the 7-tap window, 0 outside
    (this encodes the zero padding along W)."""
    w = jnp.asarray(conv_weight, jnp.float32).reshape(2, KSIZE, KSIZE)
    xi = jnp.arange(W)[:, None]                      # input (contraction) column
    xo = jnp.arange(W)[None, :]                      # output column
    dx = xi - xo + PAD                               # kernel tap index
    valid = ((dx >= 0) & (dx < KSIZE)).astype(jnp.float32)
    band = w[:, :, jnp.clip(dx, 0, KSIZE - 1)] * valid[None, None]     # (2, K, W, W)
    band = band * jnp.array([1.0 / C, 1.0], jnp.float32).reshape(2, 1, 1, 1)
    return jnp.concatenate([band[0], band[1]], axis=1)                 # (K, 2W, W)


def _spatial_attention_kernel(band_ref, x_ref, o_ref, acc_ref, pad_ref,
                              *, H, W, C, c_tile, n_cb):
    # band_ref: VMEM f32[KSIZE, 2W, W]   fused banded conv weights (resident)
    # x_ref:    VMEM [1, c_tile, H*W]    lane-folded channel tile of one batch element
    # o_ref:    VMEM [1, 1, H, W]
    # acc_ref:  VMEM f32[2, H*W]         running channel sum / channel max (lane-dense)
    # pad_ref:  VMEM f32[H+2*PAD, 2W]    finalize-only padded conv LHS (sum | max)
    c = pl.program_id(1)

    x = x_ref[0]                                              # (c_tile, H*W)
    if C % c_tile != 0:
        # Ragged channel tail: mask the out-of-bounds rows of the last block.
        ch = c * c_tile + lax.broadcasted_iota(jnp.int32, (c_tile, 1), 0)
        valid = ch < C
        neg = (jnp.finfo(x.dtype).min if jnp.issubdtype(x.dtype, jnp.floating)
               else jnp.iinfo(x.dtype).min)
        x_sum = jnp.where(valid, x, 0).astype(jnp.float32)
        x_max = jnp.where(valid, x, jnp.asarray(neg, x.dtype))
    else:
        x_sum = x.astype(jnp.float32)
        x_max = x

    # One fused, lane-dense pass over the channel tile (max stays in input dtype).
    blk_sum = jnp.sum(x_sum, axis=0, keepdims=True)                       # (1, H*W) f32
    blk_max = jnp.max(x_max, axis=0, keepdims=True).astype(jnp.float32)   # (1, H*W) f32

    def finalize(sum_row, max_row):
        # Build the padded (H+2*PAD, 2W) conv LHS once per batch element.
        pad_ref[...] = jnp.zeros_like(pad_ref)            # zero H-borders (conv padding)
        for h in range(H):                                # static unfold: lanes -> rows
            row = jnp.concatenate(
                [sum_row[:, h * W:(h + 1) * W], max_row[:, h * W:(h + 1) * W]], axis=1)
            pad_ref[pl.ds(PAD + h, 1), :] = row
        # 7 fused MXU matmuls (K = 2W covers both planes), accumulate in f32.
        out = jnp.zeros((H, W), jnp.float32)
        for dy in range(KSIZE):
            out = out + jnp.dot(pad_ref[pl.ds(dy, H), :], band_ref[dy],
                                preferred_element_type=jnp.float32)
        o_ref[0, 0] = jax.nn.sigmoid(out).astype(o_ref.dtype)

    if n_cb == 1:
        # Whole channel plane in one block: no cross-block accumulation needed.
        finalize(blk_sum, blk_max)
    else:
        @pl.when(c == 0)
        def _():
            acc_ref[pl.ds(0, 1), :] = blk_sum
            acc_ref[pl.ds(1, 1), :] = blk_max

        @pl.when(c > 0)
        def _():
            acc_ref[pl.ds(0, 1), :] = acc_ref[pl.ds(0, 1), :] + blk_sum
            acc_ref[pl.ds(1, 1), :] = jnp.maximum(acc_ref[pl.ds(1, 1), :], blk_max)

        @pl.when(c == n_cb - 1)
        def _():
            finalize(acc_ref[pl.ds(0, 1), :], acc_ref[pl.ds(1, 1), :])


def spatial_attention(x, conv_weight, *, c_tile=None, block_budget_bytes=8 << 20):
    """x: (N, C, H, W); conv_weight: (1, 2, KSIZE, KSIZE) f32 -> (N, 1, H, W)."""
    N, C, H, W = x.shape
    HW = H * W
    Hp = H + 2 * PAD

    if c_tile is None:
        c_tile = _pick_c_tile(C, HW, x.dtype, block_budget_bytes)
    c_tile = int(min(c_tile, C))
    n_cb = int(pl.cdiv(C, c_tile))

    band = _make_band(conv_weight, W, C)             # (KSIZE, 2W, W) f32
    x_folded = x.reshape(N, C, HW)                   # lane-dense channel-reduction layout

    # Tile-padding-aware VMEM estimate (double-buffered pipeline blocks + scratch).
    est = (2 * _padded_bytes((1, c_tile, HW), x.dtype)
           + 2 * _padded_bytes((1, 1, H, W), x.dtype)
           + 2 * _padded_bytes((KSIZE, 2 * W, W), jnp.float32)
           + _padded_bytes((2, HW), jnp.float32)
           + _padded_bytes((Hp, 2 * W), jnp.float32))
    vmem_limit = int(min(max(int(est * 1.3) + (1 << 20), 16 << 20), 32 << 20))

    kernel = functools.partial(_spatial_attention_kernel,
                               H=H, W=W, C=C, c_tile=c_tile, n_cb=n_cb)

    return pl.pallas_call(
        kernel,
        out_shape=jax.ShapeDtypeStruct((N, 1, H, W), x.dtype),
        grid=(N, n_cb),                                              # reduction axis last
        in_specs=[
            # fused banded weights: constant block index -> DMA'd into VMEM once
            pl.BlockSpec((KSIZE, 2 * W, W), lambda b, c: (0, 0, 0)),
            # one lane-folded channel tile of one batch element per step
            pl.BlockSpec((1, c_tile, HW), lambda b, c: (b, c, 0)),
        ],
        # output block constant along C axis -> stays resident, written at finalize
        out_specs=pl.BlockSpec((1, 1, H, W), lambda b, c: (b, 0, 0, 0)),
        scratch_shapes=[pltpu.VMEM((2, HW), jnp.float32),
                        pltpu.VMEM((Hp, 2 * W), jnp.float32)],
        compiler_params=pltpu.CompilerParams(
            dimension_semantics=("parallel", "arbitrary"),
            vmem_limit_bytes=vmem_limit),
    )(band, x_folded)


def spatial_attention_ref(x, conv_weight):
    """Pure-JAX reference mirroring the PyTorch forward (for verification)."""
    avg = jnp.mean(x, axis=1, keepdims=True)
    mx = jnp.max(x, axis=1, keepdims=True)
    cat = jnp.concatenate([avg, mx], axis=1)
    y = lax.conv_general_dilated(
        cat, conv_weight, window_strides=(1, 1),
        padding=[(PAD, PAD), (PAD, PAD)],
        dimension_numbers=("NCHW", "OIHW", "NCHW"))
    return jax.nn.sigmoid(y)


if __name__ == "__main__":
    key = jax.random.PRNGKey(0)
    kx1, kx2, kx3, kw = jax.random.split(key, 4)

    # Deterministic Conv2d(2, 1, 7, bias=False)-style weight (uniform, fan_in = 2*7*7).
    fan_in = 2 * KSIZE * KSIZE
    bound = 1.0 / (fan_in ** 0.5)
    conv_weight = jax.random.uniform(
        kw, (1, 2, KSIZE, KSIZE), jnp.float32, -bound, bound)

    # Test 1: small shape, whole channel plane in one block (n_cb == 1 fast path).
    x1 = jax.random.normal(kx1, (2, 4, 16, 16), dtype=jnp.float32)
    out1 = jax.block_until_ready(spatial_attention(x1, conv_weight))
    ref1 = spatial_attention_ref(x1, conv_weight)
    assert out1.shape == (2, 1, 16, 16), out1.shape
    assert jnp.allclose(out1, ref1, atol=1e-5, rtol=1e-5), "mismatch vs reference (test 1)"

    # Test 2: non-square spatial dims.
    x2 = jax.random.normal(kx2, (2, 40, 12, 20), dtype=jnp.float32)
    out2 = jax.block_until_ready(spatial_attention(x2, conv_weight))
    ref2 = spatial_attention_ref(x2, conv_weight)
    assert out2.shape == (2, 1, 12, 20), out2.shape
    assert jnp.allclose(out2, ref2, atol=1e-5, rtol=1e-5), "mismatch vs reference (test 2)"

    # Test 3: forced multi-block channel sweep with a ragged tail
    # (C=20, c_tile=8 -> 3 blocks; exercises accumulation + channel masking).
    x3 = jax.random.normal(kx3, (2, 20, 16, 16), dtype=jnp.float32)
    out3 = jax.block_until_ready(spatial_attention(x3, conv_weight, c_tile=8))
    ref3 = spatial_attention_ref(x3, conv_weight)
    assert out3.shape == (2, 1, 16, 16), out3.shape
    assert jnp.allclose(out3, ref3, atol=1e-5, rtol=1e-5), "mismatch vs reference (test 3)"

    print("KERNEL_OK")
</pallas_src>

<mosaic_0001>
module attributes {stable_mosaic.version = 11 : i64} {
  func.func @_spatial_attention_kernel(%arg0: i32, %arg1: i32, %arg2: memref<7x32x16xf32, #tpu.memory_space<vmem>>, %arg3: memref<1x4x256xf32, #tpu.memory_space<vmem>>, %arg4: memref<1x1x16x16xf32, #tpu.memory_space<vmem>>, %arg5: memref<2x256xf32, #tpu.memory_space<vmem>>, %arg6: memref<22x32xf32, #tpu.memory_space<vmem>>) attributes {dimension_semantics = [#tpu.dimension_semantics<parallel>, #tpu.dimension_semantics<arbitrary>], iteration_bounds = array<i64: 2, 1>, scalar_prefetch = 0 : i64, scratch_operands = 2 : i64, tpu.core_type = #tpu.core_type<tc>, window_params = [{pipeline_mode = #tpu.pipeline_mode<synchronous>, transform_indices = @transform_0, window_bounds = array<i64: 7, 32, 16>}, {transform_indices = @transform_1, window_bounds = array<i64: 1, 4, 256>}, {transform_indices = @transform_2, window_bounds = array<i64: 1, 1, 16, 16>}]} {
    %c0 = arith.constant 0 : index
    %c0_0 = arith.constant 0 : index
    %c0_1 = arith.constant 0 : index
    %0 = vector.load %arg3[%c0, %c0_0, %c0_1] : memref<1x4x256xf32, #tpu.memory_space<vmem>>, vector<1x4x256xf32>
    %1 = vector.shape_cast %0 : vector<1x4x256xf32> to vector<4x256xf32>
    %cst = arith.constant dense<0.000000e+00> : vector<256xf32>
    %2 = vector.multi_reduction <add>, %1, %cst [0] : vector<4x256xf32> to vector<256xf32>
    %3 = vector.shape_cast %2 : vector<256xf32> to vector<1x256xf32>
    %cst_2 = arith.constant dense<0xFF800000> : vector<256xf32>
    %4 = vector.multi_reduction <maximumf>, %1, %cst_2 [0] : vector<4x256xf32> to vector<256xf32>
    %5 = vector.shape_cast %4 : vector<256xf32> to vector<1x256xf32>
    %cst_3 = arith.constant 0.000000e+00 : f32
    %6 = vector.broadcast %cst_3 : f32 to vector<22x32xf32>
    %c0_4 = arith.constant 0 : index
    %c0_5 = arith.constant 0 : index
    %7 = vector.load %arg6[%c0_4, %c0_5] : memref<22x32xf32, #tpu.memory_space<vmem>>, vector<22x32xf32>
    tpu.vector_store %arg6[%c0_4, %c0_5], %6 {strides = array<i32>} : memref<22x32xf32, #tpu.memory_space<vmem>>, vector<22x32xf32>,
    %8 = vector.extract_strided_slice %3 {offsets = [0, 0], sizes = [1, 16], strides = [1, 1]} : vector<1x256xf32> to vector<1x16xf32>
    %9 = vector.extract_strided_slice %5 {offsets = [0, 0], sizes = [1, 16], strides = [1, 1]} : vector<1x256xf32> to vector<1x16xf32>
    %10 = tpu.concatenate %8, %9 in 1 : vector<1x16xf32>, vector<1x16xf32> -> vector<1x32xf32>
    %c3 = arith.constant 3 : index
    %c0_6 = arith.constant 0 : index
    %11 = vector.load %arg6[%c3, %c0_6] : memref<22x32xf32, #tpu.memory_space<vmem>>, vector<1x32xf32>
    tpu.vector_store %arg6[%c3, %c0_6], %10 {strides = array<i32>} : memref<22x32xf32, #tpu.memory_space<vmem>>, vector<1x32xf32>,
    %12 = vector.extract_strided_slice %3 {offsets = [0, 16], sizes = [1, 16], strides = [1, 1]} : vector<1x256xf32> to vector<1x16xf32>
    %13 = vector.extract_strided_slice %5 {offsets = [0, 16], sizes = [1, 16], strides = [1, 1]} : vector<1x256xf32> to vector<1x16xf32>
    %14 = tpu.concatenate %12, %13 in 1 : vector<1x16xf32>, vector<1x16xf32> -> vector<1x32xf32>
    %c4 = arith.constant 4 : index
    %c0_7 = arith.constant 0 : index
    %15 = vector.load %arg6[%c4, %c0_7] : memref<22x32xf32, #tpu.memory_space<vmem>>, vector<1x32xf32>
    tpu.vector_store %arg6[%c4, %c0_7], %14 {strides = array<i32>} : memref<22x32xf32, #tpu.memory_space<vmem>>, vector<1x32xf32>,
    %16 = vector.extract_strided_slice %3 {offsets = [0, 32], sizes = [1, 16], strides = [1, 1]} : vector<1x256xf32> to vector<1x16xf32>
    %17 = vector.extract_strided_slice %5 {offsets = [0, 32], sizes = [1, 16], strides = [1, 1]} : vector<1x256xf32> to vector<1x16xf32>
    %18 = tpu.concatenate %16, %17 in 1 : vector<1x16xf32>, vector<1x16xf32> -> vector<1x32xf32>
    %c5 = arith.constant 5 : index
    %c0_8 = arith.constant 0 : index
    %19 = vector.load %arg6[%c5, %c0_8] : memref<22x32xf32, #tpu.memory_space<vmem>>, vector<1x32xf32>
    tpu.vector_store %arg6[%c5, %c0_8], %18 {strides = array<i32>} : memref<22x32xf32, #tpu.memory_space<vmem>>, vector<1x32xf32>,
    %20 = vector.extract_strided_slice %3 {offsets = [0, 48], sizes = [1, 16], strides = [1, 1]} : vector<1x256xf32> to vector<1x16xf32>
    %21 = vector.extract_strided_slice %5 {offsets = [0, 48], sizes = [1, 16], strides = [1, 1]} : vector<1x256xf32> to vector<1x16xf32>
    %22 = tpu.concatenate %20, %21 in 1 : vector<1x16xf32>, vector<1x16xf32> -> vector<1x32xf32>
    %c6 = arith.constant 6 : index
    %c0_9 = arith.constant 0 : index
    %23 = vector.load %arg6[%c6, %c0_9] : memref<22x32xf32, #tpu.memory_space<vmem>>, vector<1x32xf32>
    tpu.vector_store %arg6[%c6, %c0_9], %22 {strides = array<i32>} : memref<22x32xf32, #tpu.memory_space<vmem>>, vector<1x32xf32>,
    %24 = vector.extract_strided_slice %3 {offsets = [0, 64], sizes = [1, 16], strides = [1, 1]} : vector<1x256xf32> to vector<1x16xf32>
    %25 = vector.extract_strided_slice %5 {offsets = [0, 64], sizes = [1, 16], strides = [1, 1]} : vector<1x256xf32> to vector<1x16xf32>
    %26 = tpu.concatenate %24, %25 in 1 : vector<1x16xf32>, vector<1x16xf32> -> vector<1x32xf32>
    %c7 = arith.constant 7 : index
    %c0_10 = arith.constant 0 : index
    %27 = vector.load %arg6[%c7, %c0_10] : memref<22x32xf32, #tpu.memory_space<vmem>>, vector<1x32xf32>
    tpu.vector_store %arg6[%c7, %c0_10], %26 {strides = array<i32>} : memref<22x32xf32, #tpu.memory_space<vmem>>, vector<1x32xf32>,
    %28 = vector.extract_strided_slice %3 {offsets = [0, 80], sizes = [1, 16], strides = [1, 1]} : vector<1x256xf32> to vector<1x16xf32>
    %29 = vector.extract_strided_slice %5 {offsets = [0, 80], sizes = [1, 16], strides = [1, 1]} : vector<1x256xf32> to vector<1x16xf32>
    %30 = tpu.concatenate %28, %29 in 1 : vector<1x16xf32>, vector<1x16xf32> -> vector<1x32xf32>
    %c8 = arith.constant 8 : index
    %c0_11 = arith.constant 0 : index
    %31 = vector.load %arg6[%c8, %c0_11] : memref<22x32xf32, #tpu.memory_space<vmem>>, vector<1x32xf32>
    tpu.vector_store %arg6[%c8, %c0_11], %30 {strides = array<i32>} : memref<22x32xf32, #tpu.memory_space<vmem>>, vector<1x32xf32>,
    %32 = vector.extract_strided_slice %3 {offsets = [0, 96], sizes = [1, 16], strides = [1, 1]} : vector<1x256xf32> to vector<1x16xf32>
    %33 = vector.extract_strided_slice %5 {offsets = [0, 96], sizes = [1, 16], strides = [1, 1]} : vector<1x256xf32> to vector<1x16xf32>
    %34 = tpu.concatenate %32, %33 in 1 : vector<1x16xf32>, vector<1x16xf32> -> vector<1x32xf32>
    %c9 = arith.constant 9 : index
    %c0_12 = arith.constant 0 : index
    %35 = vector.load %arg6[%c9, %c0_12] : memref<22x32xf32, #tpu.memory_space<vmem>>, vector<1x32xf32>
    tpu.vector_store %arg6[%c9, %c0_12], %34 {strides = array<i32>} : memref<22x32xf32, #tpu.memory_space<vmem>>, vector<1x32xf32>,
    %36 = vector.extract_strided_slice %3 {offsets = [0, 112], sizes = [1, 16], strides = [1, 1]} : vector<1x256xf32> to vector<1x16xf32>
    %37 = vector.extract_strided_slice %5 {offsets = [0, 112], sizes = [1, 16], strides = [1, 1]} : vector<1x256xf32> to vector<1x16xf32>
    %38 = tpu.concatenate %36, %37 in 1 : vector<1x16xf32>, vector<1x16xf32> -> vector<1x32xf32>
    %c10 = arith.constant 10 : index
    %c0_13 = arith.constant 0 : index
    %39 = vector.load %arg6[%c10, %c0_13] : memref<22x32xf32, #tpu.memory_space<vmem>>, vector<1x32xf32>
    tpu.vector_store %arg6[%c10, %c0_13], %38 {strides = array<i32>} : memref<22x32xf32, #tpu.memory_space<vmem>>, vector<1x32xf32>,
    %40 = vector.extract_strided_slice %3 {offsets = [0, 128], sizes = [1, 16], strides = [1, 1]} : vector<1x256xf32> to vector<1x16xf32>
    %41 = vector.extract_strided_slice %5 {offsets = [0, 128], sizes = [1, 16], strides = [1, 1]} : vector<1x256xf32> to vector<1x16xf32>
    %42 = tpu.concatenate %40, %41 in 1 : vector<1x16xf32>, vector<1x16xf32> -> vector<1x32xf32>
    %c11 = arith.constant 11 : index
    %c0_14 = arith.constant 0 : index
    %43 = vector.load %arg6[%c11, %c0_14] : memref<22x32xf32, #tpu.memory_space<vmem>>, vector<1x32xf32>
    tpu.vector_store %arg6[%c11, %c0_14], %42 {strides = array<i32>} : memref<22x32xf32, #tpu.memory_space<vmem>>, vector<1x32xf32>,
    %44 = vector.extract_strided_slice %3 {offsets = [0, 144], sizes = [1, 16], strides = [1, 1]} : vector<1x256xf32> to vector<1x16xf32>
    %45 = vector.extract_strided_slice %5 {offsets = [0, 144], sizes = [1, 16], strides = [1, 1]} : vector<1x256xf32> to vector<1x16xf32>
    %46 = tpu.concatenate %44, %45 in 1 : vector<1x16xf32>, vector<1x16xf32> -> vector<1x32xf32>
    %c12 = arith.constant 12 : index
    %c0_15 = arith.constant 0 : index
    %47 = vector.load %arg6[%c12, %c0_15] : memref<22x32xf32, #tpu.memory_space<vmem>>, vector<1x32xf32>
    tpu.vector_store %arg6[%c12, %c0_15], %46 {strides = array<i32>} : memref<22x32xf32, #tpu.memory_space<vmem>>, vector<1x32xf32>,
    %48 = vector.extract_strided_slice %3 {offsets = [0, 160], sizes = [1, 16], strides = [1, 1]} : vector<1x256xf32> to vector<1x16xf32>
    %49 = vector.extract_strided_slice %5 {offsets = [0, 160], sizes = [1, 16], strides = [1, 1]} : vector<1x256xf32> to vector<1x16xf32>
    %50 = tpu.concatenate %48, %49 in 1 : vector<1x16xf32>, vector<1x16xf32> -> vector<1x32xf32>
    %c13 = arith.constant 13 : index
    %c0_16 = arith.constant 0 : index
    %51 = vector.load %arg6[%c13, %c0_16] : memref<22x32xf32, #tpu.memory_space<vmem>>, vector<1x32xf32>
    tpu.vector_store %arg6[%c13, %c0_16], %50 {strides = array<i32>} : memref<22x32xf32, #tpu.memory_space<vmem>>, vector<1x32xf32>,
    %52 = vector.extract_strided_slice %3 {offsets = [0, 176], sizes = [1, 16], strides = [1, 1]} : vector<1x256xf32> to vector<1x16xf32>
    %53 = vector.extract_strided_slice %5 {offsets = [0, 176], sizes = [1, 16], strides = [1, 1]} : vector<1x256xf32> to vector<1x16xf32>
    %54 = tpu.concatenate %52, %53 in 1 : vector<1x16xf32>, vector<1x16xf32> -> vector<1x32xf32>
    %c14 = arith.constant 14 : index
    %c0_17 = arith.constant 0 : index
    %55 = vector.load %arg6[%c14, %c0_17] : memref<22x32xf32, #tpu.memory_space<vmem>>, vector<1x32xf32>
    tpu.vector_store %arg6[%c14, %c0_17], %54 {strides = array<i32>} : memref<22x32xf32, #tpu.memory_space<vmem>>, vector<1x32xf32>,
    %56 = vector.extract_strided_slice %3 {offsets = [0, 192], sizes = [1, 16], strides = [1, 1]} : vector<1x256xf32> to vector<1x16xf32>
    %57 = vector.extract_strided_slice %5 {offsets = [0, 192], sizes = [1, 16], strides = [1, 1]} : vector<1x256xf32> to vector<1x16xf32>
    %58 = tpu.concatenate %56, %57 in 1 : vector<1x16xf32>, vector<1x16xf32> -> vector<1x32xf32>
    %c15 = arith.constant 15 : index
    %c0_18 = arith.constant 0 : index
    %59 = vector.load %arg6[%c15, %c0_18] : memref<22x32xf32, #tpu.memory_space<vmem>>, vector<1x32xf32>
    tpu.vector_store %arg6[%c15, %c0_18], %58 {strides = array<i32>} : memref<22x32xf32, #tpu.memory_space<vmem>>, vector<1x32xf32>,
    %60 = vector.extract_strided_slice %3 {offsets = [0, 208], sizes = [1, 16], strides = [1, 1]} : vector<1x256xf32> to vector<1x16xf32>
    %61 = vector.extract_strided_slice %5 {offsets = [0, 208], sizes = [1, 16], strides = [1, 1]} : vector<1x256xf32> to vector<1x16xf32>
    %62 = tpu.concatenate %60, %61 in 1 : vector<1x16xf32>, vector<1x16xf32> -> vector<1x32xf32>
    %c16 = arith.constant 16 : index
    %c0_19 = arith.constant 0 : index
    %63 = vector.load %arg6[%c16, %c0_19] : memref<22x32xf32, #tpu.memory_space<vmem>>, vector<1x32xf32>
    tpu.vector_store %arg6[%c16, %c0_19], %62 {strides = array<i32>} : memref<22x32xf32, #tpu.memory_space<vmem>>, vector<1x32xf32>,
    %64 = vector.extract_strided_slice %3 {offsets = [0, 224], sizes = [1, 16], strides = [1, 1]} : vector<1x256xf32> to vector<1x16xf32>
    %65 = vector.extract_strided_slice %5 {offsets = [0, 224], sizes = [1, 16], strides = [1, 1]} : vector<1x256xf32> to vector<1x16xf32>
    %66 = tpu.concatenate %64, %65 in 1 : vector<1x16xf32>, vector<1x16xf32> -> vector<1x32xf32>
    %c17 = arith.constant 17 : index
    %c0_20 = arith.constant 0 : index
    %67 = vector.load %arg6[%c17, %c0_20] : memref<22x32xf32, #tpu.memory_space<vmem>>, vector<1x32xf32>
    tpu.vector_store %arg6[%c17, %c0_20], %66 {strides = array<i32>} : memref<22x32xf32, #tpu.memory_space<vmem>>, vector<1x32xf32>,
    %68 = vector.extract_strided_slice %3 {offsets = [0, 240], sizes = [1, 16], strides = [1, 1]} : vector<1x256xf32> to vector<1x16xf32>
    %69 = vector.extract_strided_slice %5 {offsets = [0, 240], sizes = [1, 16], strides = [1, 1]} : vector<1x256xf32> to vector<1x16xf32>
    %70 = tpu.concatenate %68, %69 in 1 : vector<1x16xf32>, vector<1x16xf32> -> vector<1x32xf32>
    %c18 = arith.constant 18 : index
    %c0_21 = arith.constant 0 : index
    %71 = vector.load %arg6[%c18, %c0_21] : memref<22x32xf32, #tpu.memory_space<vmem>>, vector<1x32xf32>
    tpu.vector_store %arg6[%c18, %c0_21], %70 {strides = array<i32>} : memref<22x32xf32, #tpu.memory_space<vmem>>, vector<1x32xf32>,
    %cst_22 = arith.constant 0.000000e+00 : f32
    %72 = vector.broadcast %cst_22 : f32 to vector<16x16xf32>
    %c0_23 = arith.constant 0 : index
    %c0_24 = arith.constant 0 : index
    %73 = vector.load %arg6[%c0_23, %c0_24] : memref<22x32xf32, #tpu.memory_space<vmem>>, vector<16x32xf32>
    %c0_25 = arith.constant 0 : index
    %c0_26 = arith.constant 0 : index
    %c0_27 = arith.constant 0 : index
    %74 = vector.load %arg2[%c0_25, %c0_26, %c0_27] : memref<7x32x16xf32, #tpu.memory_space<vmem>>, vector<1x32x16xf32>
    %75 = vector.shape_cast %74 : vector<1x32x16xf32> to vector<32x16xf32>
    %cst_28 = arith.constant dense<0.000000e+00> : vector<16x16xf32>
    %76 = tpu.matmul %73, %75, %cst_28 {dimension_numbers = #tpu.dot_dimension_numbers<[1], [0], [0], [1], [0, 0, 1, 1], [], []>} : vector<16x32xf32>, vector<32x16xf32>, vector<16x16xf32> -> vector<16x16xf32>
    %77 = arith.addf %72, %76 : vector<16x16xf32>
    %c1 = arith.constant 1 : index
    %c0_29 = arith.constant 0 : index
    %78 = vector.load %arg6[%c1, %c0_29] : memref<22x32xf32, #tpu.memory_space<vmem>>, vector<16x32xf32>
    %c1_30 = arith.constant 1 : index
    %c0_31 = arith.constant 0 : index
    %c0_32 = arith.constant 0 : index
    %79 = vector.load %arg2[%c1_30, %c0_31, %c0_32] : memref<7x32x16xf32, #tpu.memory_space<vmem>>, vector<1x32x16xf32>
    %80 = vector.shape_cast %79 : vector<1x32x16xf32> to vector<32x16xf32>
    %cst_33 = arith.constant dense<0.000000e+00> : vector<16x16xf32>
    %81 = tpu.matmul %78, %80, %cst_33 {dimension_numbers = #tpu.dot_dimension_numbers<[1], [0], [0], [1], [0, 0, 1, 1], [], []>} : vector<16x32xf32>, vector<32x16xf32>, vector<16x16xf32> -> vector<16x16xf32>
    %82 = arith.addf %77, %81 : vector<16x16xf32>
    %c2 = arith.constant 2 : index
    %c0_34 = arith.constant 0 : index
    %83 = vector.load %arg6[%c2, %c0_34] : memref<22x32xf32, #tpu.memory_space<vmem>>, vector<16x32xf32>
    %c2_35 = arith.constant 2 : index
    %c0_36 = arith.constant 0 : index
    %c0_37 = arith.constant 0 : index
    %84 = vector.load %arg2[%c2_35, %c0_36, %c0_37] : memref<7x32x16xf32, #tpu.memory_space<vmem>>, vector<1x32x16xf32>
    %85 = vector.shape_cast %84 : vector<1x32x16xf32> to vector<32x16xf32>
    %cst_38 = arith.constant dense<0.000000e+00> : vector<16x16xf32>
    %86 = tpu.matmul %83, %85, %cst_38 {dimension_numbers = #tpu.dot_dimension_numbers<[1], [0], [0], [1], [0, 0, 1, 1], [], []>} : vector<16x32xf32>, vector<32x16xf32>, vector<16x16xf32> -> vector<16x16xf32>
    %87 = arith.addf %82, %86 : vector<16x16xf32>
    %c3_39 = arith.constant 3 : index
    %c0_40 = arith.constant 0 : index
    %88 = vector.load %arg6[%c3_39, %c0_40] : memref<22x32xf32, #tpu.memory_space<vmem>>, vector<16x32xf32>
    %c3_41 = arith.constant 3 : index
    %c0_42 = arith.constant 0 : index
    %c0_43 = arith.constant 0 : index
    %89 = vector.load %arg2[%c3_41, %c0_42, %c0_43] : memref<7x32x16xf32, #tpu.memory_space<vmem>>, vector<1x32x16xf32>
    %90 = vector.shape_cast %89 : vector<1x32x16xf32> to vector<32x16xf32>
    %cst_44 = arith.constant dense<0.000000e+00> : vector<16x16xf32>
    %91 = tpu.matmul %88, %90, %cst_44 {dimension_numbers = #tpu.dot_dimension_numbers<[1], [0], [0], [1], [0, 0, 1, 1], [], []>} : vector<16x32xf32>, vector<32x16xf32>, vector<16x16xf32> -> vector<16x16xf32>
    %92 = arith.addf %87, %91 : vector<16x16xf32>
    %c4_45 = arith.constant 4 : index
    %c0_46 = arith.constant 0 : index
    %93 = vector.load %arg6[%c4_45, %c0_46] : memref<22x32xf32, #tpu.memory_space<vmem>>, vector<16x32xf32>
    %c4_47 = arith.constant 4 : index
    %c0_48 = arith.constant 0 : index
    %c0_49 = arith.constant 0 : index
    %94 = vector.load %arg2[%c4_47, %c0_48, %c0_49] : memref<7x32x16xf32, #tpu.memory_space<vmem>>, vector<1x32x16xf32>
    %95 = vector.shape_cast %94 : vector<1x32x16xf32> to vector<32x16xf32>
    %cst_50 = arith.constant dense<0.000000e+00> : vector<16x16xf32>
    %96 = tpu.matmul %93, %95, %cst_50 {dimension_numbers = #tpu.dot_dimension_numbers<[1], [0], [0], [1], [0, 0, 1, 1], [], []>} : vector<16x32xf32>, vector<32x16xf32>, vector<16x16xf32> -> vector<16x16xf32>
    %97 = arith.addf %92, %96 : vector<16x16xf32>
    %c5_51 = arith.constant 5 : index
    %c0_52 = arith.constant 0 : index
    %98 = vector.load %arg6[%c5_51, %c0_52] : memref<22x32xf32, #tpu.memory_space<vmem>>, vector<16x32xf32>
    %c5_53 = arith.constant 5 : index
    %c0_54 = arith.constant 0 : index
    %c0_55 = arith.constant 0 : index
    %99 = vector.load %arg2[%c5_53, %c0_54, %c0_55] : memref<7x32x16xf32, #tpu.memory_space<vmem>>, vector<1x32x16xf32>
    %100 = vector.shape_cast %99 : vector<1x32x16xf32> to vector<32x16xf32>
    %cst_56 = arith.constant dense<0.000000e+00> : vector<16x16xf32>
    %101 = tpu.matmul %98, %100, %cst_56 {dimension_numbers = #tpu.dot_dimension_numbers<[1], [0], [0], [1], [0, 0, 1, 1], [], []>} : vector<16x32xf32>, vector<32x16xf32>, vector<16x16xf32> -> vector<16x16xf32>
    %102 = arith.addf %97, %101 : vector<16x16xf32>
    %c6_57 = arith.constant 6 : index
    %c0_58 = arith.constant 0 : index
    %103 = vector.load %arg6[%c6_57, %c0_58] : memref<22x32xf32, #tpu.memory_space<vmem>>, vector<16x32xf32>
    %c6_59 = arith.constant 6 : index
    %c0_60 = arith.constant 0 : index
    %c0_61 = arith.constant 0 : index
    %104 = vector.load %arg2[%c6_59, %c0_60, %c0_61] : memref<7x32x16xf32, #tpu.memory_space<vmem>>, vector<1x32x16xf32>
    %105 = vector.shape_cast %104 : vector<1x32x16xf32> to vector<32x16xf32>
    %cst_62 = arith.constant dense<0.000000e+00> : vector<16x16xf32>
    %106 = tpu.matmul %103, %105, %cst_62 {dimension_numbers = #tpu.dot_dimension_numbers<[1], [0], [0], [1], [0, 0, 1, 1], [], []>} : vector<16x32xf32>, vector<32x16xf32>, vector<16x16xf32> -> vector<16x16xf32>
    %107 = arith.addf %102, %106 : vector<16x16xf32>
    %108 = arith.negf %107 : vector<16x16xf32>
    %109 = math.exp %108 : vector<16x16xf32>
    %cst_63 = arith.constant 1.000000e+00 : f32
    %110 = vector.broadcast %cst_63 : f32 to vector<16x16xf32>
    %111 = arith.addf %110, %109 : vector<16x16xf32>
    %112 = arith.divf %110, %111 : vector<16x16xf32>
    %c0_64 = arith.constant 0 : index
    %c0_65 = arith.constant 0 : index
    %c0_66 = arith.constant 0 : index
    %c0_67 = arith.constant 0 : index
    %113 = vector.load %arg4[%c0_64, %c0_65, %c0_66, %c0_67] : memref<1x1x16x16xf32, #tpu.memory_space<vmem>>, vector<1x1x16x16xf32>
    %114 = vector.shape_cast %113 : vector<1x1x16x16xf32> to vector<16x16xf32>
    %115 = vector.shape_cast %112 : vector<16x16xf32> to vector<1x1x16x16xf32>
    tpu.vector_store %arg4[%c0_64, %c0_65, %c0_66, %c0_67], %115 {strides = array<i32>} : memref<1x1x16x16xf32, #tpu.memory_space<vmem>>, vector<1x1x16x16xf32>,
    return
  }
  func.func @transform_0(%arg0: i32, %arg1: i32) -> (i32, i32, i32) {
    %c0_i32 = arith.constant 0 : i32
    %c0_i32_0 = arith.constant 0 : i32
    %c0_i32_1 = arith.constant 0 : i32
    %c0_i32_2 = arith.constant 0 : i32
    return %c0_i32, %c0_i32_0, %c0_i32_1 : i32, i32, i32
  }
  func.func @transform_1(%arg0: i32, %arg1: i32) -> (i32, i32, i32) {
    %c0_i32 = arith.constant 0 : i32
    %c0_i32_0 = arith.constant 0 : i32
    return %arg0, %arg1, %c0_i32 : i32, i32, i32
  }
  func.func @transform_2(%arg0: i32, %arg1: i32) -> (i32, i32, i32, i32) {
    %c0_i32 = arith.constant 0 : i32
    %c0_i32_0 = arith.constant 0 : i32
    %c0_i32_1 = arith.constant 0 : i32
    %c0_i32_2 = arith.constant 0 : i32
    return %arg0, %c0_i32, %c0_i32_0, %c0_i32_1 : i32, i32, i32, i32
  }
}

</mosaic_0001>

<bundles_post_ra>
// kernel: tpu_custom_call.1
= control target key start
LH: loop header
LB: loop body
LE: loop exit
PB: predicated region body
PF: predicated region fallthrough
CT: control target
= control target key end

     0   :  { %7 = vsyncpa [#allocation5], 0  ;;  %s1743_s0 = inlined_call_operand.vmem [shape: f32[7,32,16], index: 0, kind: input, shape index: {}]   ;;  %s1744_s1 = inlined_call_operand.vmem [shape: f32[2,4,256], index: 1, kind: input, shape index: {}]   ;;  %s1745_s2 = inlined_call_operand.hbm [shape: f32[2,1,16,16], index: 2, kind: output, shape index: {}]  }
   0x1   :  { %9 = vsyncpa [#allocation5 + $0x1], 0  ;;  %s1412_s9 = smov 0   ;;  %s1414_s10 = smov 0  }
   0x2   :  { %s1416_s11 = smov 0   ;;  %s1418_s12 = smov 0  }
   0x3   :  { %s1420_s13 = smov 0   ;;  %s1422_s14 = smov 0  }
   0x4 LB: > { %s1060_s15 = sadd.s32 4294967295, %s1384_s14   ;;  %s1061_s16 = sadd.s32 4294967294, %s1384_s14   ;;  %s1384_s14 = sphi %s1422_s14, %s15_s14   ;;  %s1380_s13 = sphi %s1420_s13, %s1752_s13   ;;  %s1376_s12 = sphi %s1418_s12, %s1751_s12   ;;  %s1372_s11 = sphi %s1416_s11, %s1750_s11   ;;  %s1368_s10 = sphi %s1414_s10, %s1749_s10   ;;  %s1364_s9 = sphi %s1412_s9, %s1748_s9  }
   0x5   : > { %s27_s17 = sadd.s32 1, %s1380_s13  ;;  %s83_s18 = sadd.s32 1, %s1372_s11 }
   0x6   : > { %p29_p0 = scmp.ge.s32.totalorder %s27_s17, 2  ;;  %p93_p1 = scmp.ne.s32.totalorder %s1372_s11, %s1368_s10 }
   0x7   : > { %p94_p2 = scmp.eq.s32.totalorder %s1060_s15, 1  ;;  %p99_p3 = scmp.ne.s32.totalorder %s1368_s10, %s1364_s9 }
   0x8   : > { %s1754_s17 = smov (%p29_p0, %s27_s17), 0  ;;  %p100_p5 = scmp.eq.s32.totalorder %s1061_s16, 1 }
   0x9   : > { %p1452_p4 = por %p94_p2, %p93_p1  ;;  %s80_s20 = ssub.s32 %s1380_s13, %s1754_s17 }
   0xa   : > { %p1064_p6 = scmp.ge.s32.totalorder %s1384_s14, 1  ;;  %p81_p7 = scmp.eq.s32.totalorder %s80_s20, 0 }
   0xb   : > { %p1459_p8 = por %p100_p5, %p99_p3  ;;  %p133_p9 = scmp.lt.s32.totalorder %s1384_s14, 3 }
   0xc   : > { %s1465_s22 = scalar_select %p81_p7, %s1372_s11, %s83_s18  }
   0xd   : > { %p134_p10 = pnand %p1064_p6, %p133_p9 }
   0xe   : > { %p159_p11 = scmp.lt.s32.totalorder (!%p134_p10), %s1376_s12, 1  ;;  %s1387_s28 = smov (!%p134_p10), 16  }
   0xf   : > { %137 = sbr.rel (%p134_p10) target bundleno = 475 (0x1db), region = 28  ;;  %s1388_s29 = smov (!%p134_p10), 96  }
  0x10   : > { %s1389_s30 = smov (!%p134_p10), 112   ;;  %s1390_s3 = smov (!%p134_p10), 80  }
  0x11   : > { %s1391_s4 = smov (!%p134_p10), 64   ;;  %s1392_s5 = smov (!%p134_p10), 48  }
  0x12   : > { %s1393_s6 = smov (!%p134_p10), 32   ;;  %s1394_s7 = smov (!%p134_p10), [#allocation4]  }
  0x13   : > { %s1312_s8 = sshll.u32 (!%p134_p10), %s1394_s7, 4  ;;  %s1313_s8 = int_to_ptr.vmem [resolvable:$false] %s1312_s8 }
  0x14   : > { %vm201_vm0 = vcmask 261120   ;;  %v1386_v0 = vmov 0.0   ;;  %s160_s23 = scalar_select %p159_p11, %s1376_s12, 1  ;;  %vm172_vm1 = vcmask 1043456   ;;  %v333_v31 = vld [vmem:[%s1743_s0 + $0x18] sm:$0xff]  ;;  %v332_v32 = vld [vmem:[%s1743_s0 + $0x10] sm:$0xff] }
  0x15   : > { %202 = vst.msk [vmem:[#allocation3] sm:$0xff] %vm201_vm0, %v1386_v0  ;;  %203 = vst.msk [vmem:[#allocation3 + $0x8] sm:$0xff] %vm201_vm0, %v1386_v0  ;;  %1168 = vmatprep.subr.mxu1 %v333_v31  ;;  %vm204_vm2 = vcmask 259072   ;;  %v1071_v33 = vld [vmem:[%s1743_s0 + $0x38] sm:$0xff]  ;;  %v331_v34 = vld [vmem:[%s1743_s0 + $0x8] sm:$0xff]  ;;  %vm210_vm3 = vcmask 130048  }
  0x16   : > { %s1113_s24 = sshll.u32 %s160_s23, 3  ;;  %1169 = vmatpush3.msra.mxu1 %v333_v31  ;;  %205 = vst.msk [vmem:[#allocation3 + $0x10] sm:$0x3f] %vm204_vm2, %v1386_v0  ;;  %1157 = vmatprep.subr.mxu0 %v1071_v33  ;;  %v1070_v35 = vld [vmem:[%s1743_s0 + $0x30] sm:$0xff]  ;;  %v330_v36 = vld [vmem:[%s1743_s0] sm:$0xff]  ;;  %v1069_v37 = vld [vmem:[%s1743_s0 + $0x28] sm:$0xff] }
  0x17   : > { %s167_s27 = scalar_lea.vmem %s1744_s1, %s1113_s24  ;;  %1170 = vmatprep.subr.mxu1 %v332_v32  ;;  %1158 = vmatpush3.msra.mxu0 %v1071_v33  ;;  %v1068_v38 = vld [vmem:[%s1743_s0 + $0x20] sm:$0xff]  ;;  %v1556_v39 = vld [vmem:[%s1743_s0 + $0x78] sm:$0xff]  ;;  %vm212_vm4 = vcmask 253952   ;;  %v1077_v31 = vld [vmem:[%s1743_s0 + $0x48] sm:$0xff]  ;;  %s1314_s15 = scalar_lea.vmem %s1313_s8, 512 }
  0x18   : > { %v168_v1 = vld [vmem:[%s167_s27] sm:$0xff]  ;;  %1171 = vmatpush3.msra.mxu1 %v332_v32  ;;  %1159 = vmatprep.subr.mxu0 %v1070_v35  ;;  %v1561_v40 = vld [vmem:[%s1743_s0 + $0x58] sm:$0xff] }
  0x19   : > { %v187_v2 = vsel %vm172_vm1, %v168_v1, -inf  ;;  %v173_v3 = vsel %vm172_vm1, %v168_v1, 0.0  ;;  %v170_v14 = vcombine.high %v168_v1, %v168_v1  ;;  %1172 = vmatprep.subr.mxu1 %v331_v34  ;;  %1160 = vmatpush3.msra.mxu0 %v1070_v35  ;;  %v1097_v32 = vld [vmem:[%s1743_s0 + $0xb8] sm:$0xff]  ;;  %v1076_v33 = vld [vmem:[%s1743_s0 + $0x40] sm:$0xff] }
  0x1a   : > { %v188_v4 = vrot.slane %v187_v2, 4  ;;  %v174_v5 = vrot.slane %v173_v3, 4  ;;  %1173 = vmatpush3.msra.mxu1 %v331_v34  ;;  %1161 = vmatprep.subr.mxu0 %v1069_v37  ;;  %v1091_v34 = vld [vmem:[%s1743_s0 + $0x98] sm:$0xff] }
  0x1b   : > { %v194_v17 = vsel %vm172_vm1, %v170_v14, -inf  ;;  %v180_v18 = vsel %vm172_vm1, %v170_v14, 0.0  ;;  %1174 = vmatprep.subr.mxu1 %v330_v36  ;;  %1162 = vmatpush3.msra.mxu0 %v1069_v37  ;;  %v1090_v37 = vld [vmem:[%s1743_s0 + $0x90] sm:$0xff] }
  0x1c   : > { %v189_v6 = vmax.f32 %v187_v2, %v188_v4  ;;  %v175_v7 = vadd.f32 %v174_v5, %v173_v3  ;;  %v195_v19 = vrot.slane %v194_v17, 4  ;;  %v181_v20 = vrot.slane %v180_v18, 4  ;;  %1175 = vmatpush3.msra.mxu1 %v330_v36  ;;  %1163 = vmatprep.subr.mxu0 %v1068_v38 }
  0x1d   : > { %1190 = vmatprep.subr.mxu1 %v1556_v39  ;;  %1164 = vmatpush3.msra.mxu0 %v1068_v38  ;;  %v1096_v38 = vld [vmem:[%s1743_s0 + $0xb0] sm:$0xff] }
  0x1e   : > { %v190_v8 = vrot.slane %v189_v6, 2  ;;  %v176_v9 = vrot.slane %v175_v7, 2  ;;  %v196_v21 = vmax.f32 %v194_v17, %v195_v19  ;;  %v182_v22 = vadd.f32 %v181_v20, %v180_v18  ;;  %1179 = vmatprep.subr.mxu0 %v1561_v40 }
  0x20   : > { %v191_v10 = vmax.f32 %v189_v6, %v190_v8  ;;  %v177_v11 = vadd.f32 %v176_v9, %v175_v7  ;;  %v197_v23 = vrot.slane %v196_v21, 2  ;;  %v183_v24 = vrot.slane %v182_v22, 2 }
  0x22   : > { %v192_v12 = vrot.slane %v191_v10, 1  ;;  %v178_v13 = vrot.slane %v177_v11, 1  ;;  %v198_v25 = vmax.f32 %v196_v21, %v197_v23  ;;  %v184_v26 = vadd.f32 %v183_v24, %v182_v22  ;;  %v1084_v21 = vld [vmem:[%s1743_s0 + $0x70] sm:$0xff]  ;;  %v1083_v23 = vld [vmem:[%s1743_s0 + $0x68] sm:$0xff] }
  0x24   : > { %v1478_v15 = vmax.f32 %v191_v10, %v192_v12  ;;  %v1480_v16 = vadd.f32 %v178_v13, %v177_v11  ;;  %v199_v27 = vrot.slane %v198_v25, 1  ;;  %v185_v28 = vrot.slane %v184_v26, 1 }
  0x26   : > { %207 = vrot.lane.b32.xlu0 %v1478_v15, %s1387_s28  ;;  %220 = vrot.lane.b32.xlu1 %v1480_v16, %s1388_s29  ;;  %v1512_v29 = vmax.f32 %v198_v25, %v199_v27  ;;  %v1514_v30 = vadd.f32 %v185_v28, %v184_v26  ;;  %v1078_v28 = vld [vmem:[%s1743_s0 + $0x50] sm:$0xff] }
  0x2a   : > { %223 = vrot.lane.b32.xlu1 %v1478_v15, %s1389_s30  ;;  %215 = vrot.lane.b32.xlu0 %v1480_v16, %s1389_s30 }
  0x2e   : > { %231 = vrot.lane.b32.xlu1 %v1478_v15, %s1388_s29  ;;  %228 = vrot.lane.b32.xlu0 %v1480_v16, %s1390_s3 }
  0x32   : > { %239 = vrot.lane.b32.xlu1 %v1478_v15, %s1390_s3  ;;  %236 = vrot.lane.b32.xlu0 %v1480_v16, %s1391_s4 }
  0x36   : > { %247 = vrot.lane.b32.xlu1 %v1478_v15, %s1391_s4  ;;  %244 = vrot.lane.b32.xlu0 %v1480_v16, %s1392_s5 }
  0x3a   : > { %255 = vrot.lane.b32.xlu1 %v1478_v15, %s1392_s5  ;;  %252 = vrot.lane.b32.xlu0 %v1480_v16, %s1393_s6 }
  0x3e   : > { %263 = vrot.lane.b32.xlu1 %v1478_v15, %s1393_s6  ;;  %260 = vrot.lane.b32.xlu0 %v1480_v16, %s1387_s28 }
  0x42   : > { %269 = vrot.lane.b32.xlu0 %v1512_v29, %s1387_s28  ;;  %275 = vrot.lane.b32.xlu1 %v1514_v30, %s1389_s30 }
  0x46   : > { %280 = vrot.lane.b32.xlu0 %v1514_v30, %s1388_s29  ;;  %283 = vrot.lane.b32.xlu1 %v1512_v29, %s1389_s30 }
  0x4a   : > { %288 = vrot.lane.b32.xlu0 %v1514_v30, %s1390_s3  ;;  %291 = vrot.lane.b32.xlu1 %v1512_v29, %s1388_s29 }
  0x4e   : > { %296 = vrot.lane.b32.xlu0 %v1514_v30, %s1391_s4  ;;  %299 = vrot.lane.b32.xlu1 %v1512_v29, %s1390_s3  ;;  %s1114_s3 = sshll.u32 %s1376_s12, 8 }
  0x4f   : > { %s1692_s26 = scalar_lea.hbm %s1745_s2, %s1114_s3 }
  0x52   : > { %304 = vrot.lane.b32.xlu0 %v1514_v30, %s1392_s5  ;;  %307 = vrot.lane.b32.xlu1 %v1512_v29, %s1391_s4 }
  0x56   : > { %312 = vrot.lane.b32.xlu0 %v1514_v30, %s1393_s6  ;;  %315 = vrot.lane.b32.xlu1 %v1512_v29, %s1392_s5 }
  0x5a   : > { %320 = vrot.lane.b32.xlu0 %v1514_v30, %s1387_s28  ;;  %323 = vrot.lane.b32.xlu1 %v1512_v29, %s1393_s6  ;;  %s156_s28 = sand.u32 1, %s1368_s10  }
  0x5b   : > { %s1065_s29 = sshll.u32 %s156_s28, 4  ;;  %s1698_s27 = scalar_lea.sflag [#allocation5], %s156_s28 }
  0x5c   : > { %s158_s4 = scalar_lea.vmem [#allocation4], %s1065_s29 }
  0x5d   : > { %s981_s5 = sshll.u32 %s158_s4, 4  ;;  %s1694_s5 = int_to_ptr.vmem [resolvable:$true] %s981_s5 }
  0x5e   : > { %s1308_s12 = scalar_lea.vmem %s1694_s5, 256  ;;  %p1315_p1 = scmp.lt.s32.totalorder %s1694_s5, %s1313_s8 }
  0x5f   : > { %p1309_p12 = scmp.ne.s32.totalorder %s1694_s5, %s1308_s12  ;;  %p1316_p2 = scmp.lt.s32.totalorder %s1314_s15, %s1308_s12 }
  0x61   : > { %p1310_p13 = pnand %p1309_p12, %p1452_p4  ;;  %p1317_p3 = por %p1316_p2, %p1315_p1 }
  0x63   : > { %p1311_p0 = pneg %p1310_p13 }
  0x65   : > { %p1318_p5 = pnand %p1317_p3, %p1311_p0 }
  0x98   : > { %v208_v41 = vpop.permute.xlu0 %207  ;;  %v221_v42 = vpop.permute.xlu1 %220 }
  0x99   : > { %v211_v43 = vsel %vm210_vm3, %v1480_v16, %v208_v41 }
  0x9a   : > { %213 = vst.msk [vmem:[#allocation3 + $0x3] sm:$0x1] %vm212_vm4, %v211_v43  ;;  %v1088_v43 = vld [vmem:[%s1743_s0 + $0x80] sm:$0xff] }
  0x9c   : > { %v224_v44 = vpop.permute.xlu1 %223  ;;  %v216_v45 = vpop.permute.xlu0 %215 }
  0x9d   : > { %v226_v46 = vsel %vm210_vm3, %v221_v42, %v224_v44  ;;  %v218_v47 = vsel %vm210_vm3, %v216_v45, %v1478_v15  ;;  %v1095_v42 = vld [vmem:[%s1743_s0 + $0xa8] sm:$0xff]  ;;  %v1094_v44 = vld [vmem:[%s1743_s0 + $0xa0] sm:$0xff]  ;;  %v1103_v45 = vld [vmem:[%s1743_s0 + $0xd8] sm:$0xff] }
  0x9e   : > { %227 = vst.msk [vmem:[#allocation3 + $0x5] sm:$0x1] %vm212_vm4, %v226_v46  ;;  %219 = vst.msk [vmem:[#allocation3 + $0x4] sm:$0x1] %vm212_vm4, %v218_v47 }
  0xa0   : > { %v232_v48 = vpop.permute.xlu1 %231  ;;  %v229_v49 = vpop.permute.xlu0 %228 }
  0xa1   : > { %v234_v50 = vsel %vm210_vm3, %v229_v49, %v232_v48  ;;  %v1102_v48 = vld [vmem:[%s1743_s0 + $0xd0] sm:$0xff] }
  0xa2   : > { %235 = vst.msk [vmem:[#allocation3 + $0x6] sm:$0x1] %vm212_vm4, %v234_v50  ;;  %v1101_v50 = vld [vmem:[%s1743_s0 + $0xc8] sm:$0xff] }
  0xa4   : > { %v240_v51 = vpop.permute.xlu1 %239  ;;  %v237_v52 = vpop.permute.xlu0 %236 }
  0xa5   : > { %v242_v53 = vsel %vm210_vm3, %v237_v52, %v240_v51  ;;  %v1100_v51 = vld [vmem:[%s1743_s0 + $0xc0] sm:$0xff] }
  0xa6   : > { %243 = vst.msk [vmem:[#allocation3 + $0x7] sm:$0x1] %vm212_vm4, %v242_v53 }
  0xa8   : > { %v248_v54 = vpop.permute.xlu1 %247  ;;  %v245_v55 = vpop.permute.xlu0 %244 }
  0xa9   : > { %v250_v56 = vsel %vm210_vm3, %v245_v55, %v248_v54 }
  0xaa   : > { %251 = vst.msk [vmem:[#allocation3 + $0x8] sm:$0x1] %vm212_vm4, %v250_v56 }
  0xac   : > { %v256_v57 = vpop.permute.xlu1 %255  ;;  %v253_v58 = vpop.permute.xlu0 %252 }
  0xad   : > { %v258_v59 = vsel %vm210_vm3, %v253_v58, %v256_v57  ;;  %v328_v60 = vld [vmem:[#allocation3] sm:$0xff] }
  0xae   : > { %259 = vst.msk [vmem:[#allocation3 + $0x9] sm:$0x1] %vm212_vm4, %v258_v59  ;;  %1176 = vmatprep.mubr.msk.f32.mxu1 %vm201_vm0, %v328_v60 }
  0xb0   : > { %v264_v61 = vpop.permute.xlu1 %263  ;;  %v261_v62 = vpop.permute.xlu0 %260 }
  0xb1   : > { %v266_v63 = vsel %vm210_vm3, %v261_v62, %v264_v61  ;;  %v334_v0 = vld [vmem:[#allocation3 + $0x1] sm:$0xff] }
  0xb2   : > { %267 = vst.msk [vmem:[#allocation3 + $0xa] sm:$0x1] %vm212_vm4, %v266_v63  ;;  %1165 = vmatprep.mubr.msk.f32.mxu0 %vm201_vm0, %v334_v0 }
  0xb4   : > { %v270_v1 = vpop.permute.xlu0 %269  ;;  %v276_v2 = vpop.permute.xlu1 %275 }
  0xb5   : > { %v272_v3 = vsel %vm210_vm3, %v1514_v30, %v270_v1  ;;  %v278_v4 = vsel %vm210_vm3, %v276_v2, %v1512_v29  ;;  %v503_v29 = vld [vmem:[#allocation3 + $0x2] sm:$0xff] }
  0xb6   : > { %273 = vst.msk [vmem:[#allocation3 + $0xb] sm:$0x1] %vm212_vm4, %v272_v3  ;;  %279 = vst.msk [vmem:[#allocation3 + $0xc] sm:$0x1] %vm212_vm4, %v278_v4  ;;  %v1082_v30 = vld [vmem:[%s1743_s0 + $0x60] sm:$0xff] }
  0xb8   : > { %v281_v5 = vpop.permute.xlu0 %280  ;;  %v284_v6 = vpop.permute.xlu1 %283 }
  0xb9   : > { %v286_v7 = vsel %vm210_vm3, %v281_v5, %v284_v6  ;;  %v593_v22 = vld [vmem:[#allocation3 + $0x3] sm:$0xff] }
  0xba   : > { %287 = vst.msk [vmem:[#allocation3 + $0xd] sm:$0x1] %vm212_vm4, %v286_v7 }
  0xbc   : > { %v289_v8 = vpop.permute.xlu0 %288  ;;  %v292_v9 = vpop.permute.xlu1 %291 }
  0xbd   : > { %v294_v10 = vsel %vm210_vm3, %v289_v8, %v292_v9  ;;  %v773_v41 = vld [vmem:[#allocation3 + $0x5] sm:$0xff] }
  0xbe   : > { %295 = vst.msk [vmem:[#allocation3 + $0xe] sm:$0x1] %vm212_vm4, %v294_v10 }
  0xc0   : > { %v297_v11 = vpop.permute.xlu0 %296  ;;  %v300_v12 = vpop.permute.xlu1 %299 }
  0xc1   : > { %v302_v13 = vsel %vm210_vm3, %v297_v11, %v300_v12  ;;  %v863_v49 = vld [vmem:[#allocation3 + $0x6] sm:$0xff] }
  0xc2   : > { %303 = vst.msk [vmem:[#allocation3 + $0xf] sm:$0x1] %vm212_vm4, %v302_v13 }
  0xc4   : > { %v305_v14 = vpop.permute.xlu0 %304  ;;  %v308_v15 = vpop.permute.xlu1 %307 }
  0xc5   : > { %v310_v16 = vsel %vm210_vm3, %v305_v14, %v308_v15 }
  0xc6   : > { %311 = vst.msk [vmem:[#allocation3 + $0x10] sm:$0x1] %vm212_vm4, %v310_v16 }
  0xc8   : > { %v313_v17 = vpop.permute.xlu0 %312  ;;  %v316_v18 = vpop.permute.xlu1 %315 }
  0xc9   : > { %v318_v19 = vsel %vm210_vm3, %v313_v17, %v316_v18  ;;  %v329_v20 = vld [vmem:[#allocation3 + $0x8] sm:$0xff] }
  0xca   : > { %319 = vst.msk [vmem:[#allocation3 + $0x11] sm:$0x1] %vm212_vm4, %v318_v19  ;;  %1177 = vmatmul.mubr.msk.f32.vlgmr.msra.gmra.mxu1 %vm201_vm0, %v329_v20 }
  0xcb   : > { %1198 = vmatprep.mubr.msk.f32.mxu1 %vm201_vm0, %v593_v22  ;;  %1191 = vmatpush3.msra.mxu1 %v1556_v39  ;;  %v683_v39 = vld [vmem:[#allocation3 + $0x4] sm:$0xff] }
  0xcc   : > { %v321_v24 = vpop.permute.xlu0 %320  ;;  %v324_v25 = vpop.permute.xlu1 %323  ;;  %1192 = vmatprep.subr.mxu1 %v1084_v21 }
  0xcd   : > { %v326_v26 = vsel %vm210_vm3, %v321_v24, %v324_v25  ;;  %v335_v27 = vld [vmem:[#allocation3 + $0x9] sm:$0xff]  ;;  %1193 = vmatpush3.msra.mxu1 %v1084_v21 }
  0xce   : > { %327 = vst.msk [vmem:[#allocation3 + $0x12] sm:$0x1] %vm212_vm4, %v326_v26  ;;  %1166 = vmatmul.mubr.msk.f32.vlgmr.msra.gmra.mxu0 %vm201_vm0, %v335_v27  ;;  %1194 = vmatprep.subr.mxu1 %v1083_v23 }
  0xcf   : > { %1180 = vmatpush3.msra.mxu0 %v1561_v40  ;;  %1187 = vmatprep.mubr.msk.f32.mxu0 %vm201_vm0, %v503_v29  ;;  %v1089_v40 = vld [vmem:[%s1743_s0 + $0x88] sm:$0xff] }
  0xd0   : > { %1181 = vmatprep.subr.mxu0 %v1078_v28  ;;  %1195 = vmatpush3.msra.mxu1 %v1083_v23 }
  0xd1   : > { %1182 = vmatpush3.msra.mxu0 %v1078_v28  ;;  %1196 = vmatprep.subr.mxu1 %v1082_v30  ;;  %v504_v35 = vld [vmem:[#allocation3 + $0xa] sm:$0xff] }
  0xd2   : > { %1183 = vmatprep.subr.mxu0 %v1077_v31  ;;  %1197 = vmatpush3.msra.mxu1 %v1082_v30 }
  0xd3   : > { %1184 = vmatpush3.msra.mxu0 %v1077_v31  ;;  %1212 = vmatprep.subr.mxu1 %v1097_v32 }
  0xd4   : > { %1185 = vmatprep.subr.mxu0 %v1076_v33 }
  0xd5   : > { %1186 = vmatpush3.msra.mxu0 %v1076_v33  ;;  %v594_v36 = vld [vmem:[#allocation3 + $0xb] sm:$0xff] }
  0xd6   : > { %1188 = vmatmul.mubr.msk.f32.vlgmr.msra.gmra.mxu0 %vm201_vm0, %v504_v35  ;;  %1201 = vmatprep.subr.mxu0 %v1091_v34  ;;  %v684_v46 = vld [vmem:[#allocation3 + $0xc] sm:$0xff] }
  0xd7   : > { %1199 = vmatmul.mubr.msk.f32.vlgmr.msra.gmra.mxu1 %vm201_vm0, %v594_v36  ;;  %1202 = vmatpush3.msra.mxu0 %v1091_v34  ;;  %v774_v47 = vld [vmem:[#allocation3 + $0xd] sm:$0xff] }
  0xd8   : > { %1209 = vmatprep.mubr.msk.f32.mxu0 %vm201_vm0, %v683_v39  ;;  %1213 = vmatpush3.msra.mxu1 %v1097_v32  ;;  %v864_v52 = vld [vmem:[#allocation3 + $0xe] sm:$0xff] }
  0xd9   : > { %1203 = vmatprep.subr.mxu0 %v1090_v37  ;;  %1214 = vmatprep.subr.mxu1 %v1096_v38 }
  0xda   : > { %1220 = vmatprep.mubr.msk.f32.mxu1 %vm201_vm0, %v773_v41  ;;  %1204 = vmatpush3.msra.mxu0 %v1090_v37 }
  0xdb   : > { %1215 = vmatpush3.msra.mxu1 %v1096_v38  ;;  %1205 = vmatprep.subr.mxu0 %v1089_v40 }
  0xdc   : > { %1216 = vmatprep.subr.mxu1 %v1095_v42  ;;  %1206 = vmatpush3.msra.mxu0 %v1089_v40 }
  0xdd   : > { %1217 = vmatpush3.msra.mxu1 %v1095_v42  ;;  %1207 = vmatprep.subr.mxu0 %v1088_v43 }
  0xde   : > { %1218 = vmatprep.subr.mxu1 %v1094_v44  ;;  %1208 = vmatpush3.msra.mxu0 %v1088_v43 }
  0xdf   : > { %1219 = vmatpush3.msra.mxu1 %v1094_v44  ;;  %1210 = vmatmul.mubr.msk.f32.vlgmr.msra.gmra.mxu0 %vm201_vm0, %v684_v46 }
  0xe0   : > { %1221 = vmatmul.mubr.msk.f32.vlgmr.msra.gmra.mxu1 %vm201_vm0, %v774_v47  ;;  %1223 = vmatprep.subr.mxu0 %v1103_v45 }
  0xe1   : > { %1224 = vmatpush3.msra.mxu0 %v1103_v45  ;;  %1231 = vmatprep.mubr.msk.f32.mxu0 %vm201_vm0, %v863_v49 }
  0xe2   : > { %1225 = vmatprep.subr.mxu0 %v1102_v48 }
  0xe3   : > { %1226 = vmatpush3.msra.mxu0 %v1102_v48 }
  0xe4   : > { %1227 = vmatprep.subr.mxu0 %v1101_v50 }
  0xe5   : > { %1228 = vmatpush3.msra.mxu0 %v1101_v50 }
  0xe6   : > { %1229 = vmatprep.subr.mxu0 %v1100_v51 }
  0xe7   : > { %1230 = vmatpush3.msra.mxu0 %v1100_v51 }
  0xe8   : > { %1232 = vmatmul.mubr.msk.f32.vlgmr.msra.gmra.mxu0 %vm201_vm0, %v864_v52 }
 0x18a   : > { %v1178_v54 = vpop.f32.mrf.mxu1 }
 0x18c   : > { %v494_v57 = vpop.f32.mrf.mxu1 }
 0x18e   : > { %v1167_v53 = vpop.f32.mrf.mxu0 }
 0x18f   : > { %v500_v58 = vadd.f32 %v1178_v54, %v1167_v53 }
 0x190   : > { %v413_v55 = vpop.f32.mrf.mxu0 }
 0x191   : > { %v495_v61 = vadd.f32 %v494_v57, %v413_v55 }
 0x196   : > { %v1189_v56 = vpop.f32.mrf.mxu0 }
 0x197   : > { %v1200_v59 = vpop.f32.mrf.mxu1  ;;  %v592_v62 = vadd.f32 %v1189_v56, %v500_v58 }
 0x198   : > { %v582_v60 = vpop.f32.mrf.mxu0 }
 0x199   : > { %v591_v63 = vadd.f32 %v582_v60, %v495_v61  ;;  %v672_v1 = vpop.f32.mrf.mxu1  ;;  %v682_v2 = vadd.f32 %v1200_v59, %v592_v62 }
 0x19b   : > { %v681_v4 = vadd.f32 %v672_v1, %v591_v63 }
 0x19f   : > { %v1211_v0 = vpop.f32.mrf.mxu0 }
 0x1a0   : > { %v772_v5 = vadd.f32 %v1211_v0, %v682_v2  ;;  %v1222_v6 = vpop.f32.mrf.mxu1 }
 0x1a1   : > { %v762_v3 = vpop.f32.mrf.mxu0 }
 0x1a2   : > { %v771_v7 = vadd.f32 %v762_v3, %v681_v4  ;;  %v862_v8 = vadd.f32 %v1222_v6, %v772_v5  ;;  %v852_v9 = vpop.f32.mrf.mxu1 }
 0x1a4   : > { %v861_v11 = vadd.f32 %v852_v9, %v771_v7 }
 0x1a8   : > { %v1233_v10 = vpop.f32.mrf.mxu0 }
 0x1a9   : > { %v952_v12 = vadd.f32 %v1233_v10, %v862_v8 }
 0x1aa   : > { %v942_v13 = vpop.f32.mrf.mxu0 }
 0x1ab   : > { %v1107_v14 = vmul.f32 -1.442695, %v952_v12  ;;  %v951_v15 = vadd.f32 %v942_v13, %v861_v11 }
 0x1ad   : > { %1300 = vpow2.f32 %v1107_v14  ;;  %v1106_v16 = vmul.f32 -1.442695, %v951_v15 }
 0x1af   : > { %1302 = vpow2.f32 %v1106_v16 }
 0x1ba   : > { %v1301_v17 = vpop.eup %1300 }
 0x1bb   : > { %v960_v18 = vadd.f32 1.0, %v1301_v17 }
 0x1bc   : > { %v1303_v19 = vpop.eup %1302 }
 0x1bd   : > { %1304 = vrcp.f32 %v960_v18  ;;  %v959_v20 = vadd.f32 1.0, %v1303_v19 }
 0x1bf   : > { %1306 = vrcp.f32 %v959_v20 }
 0x1ca   : > { %v1305_v21 = vpop.eup %1304 }
 0x1cb   : > { %966 = vst.msk [vmem:[%s158_s4 + $0x8] sm:$0xff] %vm210_vm3, %v1305_v21 }
 0x1cc   : > { %v1307_v22 = vpop.eup %1306 }
 0x1cd   : > { %965 = vst.msk [vmem:[%s158_s4] sm:$0xff] %vm210_vm3, %v1307_v22 }
 0x1ce   : > { %1321 = shalt.err (!%p1318_p5)
}
 0x1cf   : > { %s1322_s30 = scalar_lea.hbm %s1692_s26, 256  ;;  %s1326_s20 = scalar_lea.hbm %s1745_s2, 512 }
 0x1d0   : > { %p1323_p6 = scmp.ne.s32.totalorder %s1692_s26, %s1322_s30  ;;  %p1327_p10 = scmp.lt.s32.totalorder %s1692_s26, %s1745_s2 }
 0x1d1   : > { %p1328_p11 = scmp.lt.s32.totalorder %s1326_s20, %s1322_s30 }
 0x1d2   : > { %p1324_p7 = pnand %p1323_p6, %p1452_p4 }
 0x1d3   : > { %p1329_p12 = por %p1328_p11, %p1327_p10 }
 0x1d4   : > { %p1325_p9 = pneg %p1324_p7 }
 0x1d6   : > { %p1330_p13 = pnand %p1329_p12, %p1325_p9 }
 0x1d8   : > { %1333 = shalt.err (!%p1330_p13)
}
 0x1d9   : > { %s1395_s28 = smov 128   ;;  %s1396_s29 = smov 8  }
 0x1da   : > { %1234 = dma.vmem_to_hbm [thread:$0]  (%p1452_p4), %s1694_s5, 256, %s1692_s26, %s1698_s27, %s1395_s28, %s1395_s28, %s1396_s29  }
 0x1db PF: > { %p1240_p0 = scmp.ge.s32.totalorder %s1384_s14, 2  ;;  %s996_s3 = sand.u32 1, %s1364_s9  }
 0x1dc   : > { %s997_s4 = scalar_lea.sflag [#allocation5], %s996_s3 }
 0x1dd   : > { %p1237_p1 = pnand %p1240_p0, %p1459_p8 }
 0x1df   : > { %p1238_p2 = pneg %p1237_p1 }
 0x1e1   : > { %1359 = dma.done.wait (%p1238_p2), %s997_s4, 256  }
 0x1e2   : > { %1361 = vsyncadd (%p1238_p2), %s997_s4, 4294967040  ;;  %s15_s14 = sadd.s32 1, %s1384_s14   ;;  %s1748_s9 = smov %s1368_s10 }
 0x1e3   : > { %p12_p3 = scmp.ge.s32.totalorder %s15_s14, 4   ;;  %s1749_s10 = smov %s1372_s11 }
 0x1e4   : > { %s1750_s11 = smov %s1465_s22  ;;  %s1751_s12 = smov %s1380_s13 }
 0x1e5   : > { %s1752_s13 = smov %s1754_s17  ;;  %14 = sbr.rel (!%p12_p3) target bundleno = 4 (0x4), region = 69 }
 0x1ea   :  { %1002 = vsyncpa [#allocation5], 1 }
 0x1eb   :  { %1004 = vsyncpa [#allocation5 + $0x1], 1 }

</bundles_post_ra>
